<compile_context>
chip_gen: v7x
topology: tpu7x:2x2x1
jax: 0.10.0
libtpu: 0.0.40
codegen_flags: <defaults>
</compile_context>

<pallas_src>
import jax
import jax.numpy as jnp
import numpy as np
from jax.experimental import pallas as pl
from jax.experimental.pallas import tpu as pltpu


def _copy_net_gru_kernel(emb_ref, w2_ref, h0_ref, wih_e_ref, wih_w_ref,
                         whh_ref, bih_ref, bhh_ref, out_ref, gi_ref):
    """Single-invocation, fused-gate GRU recurrence.

    emb_ref:   [T*B, E]  time-major flattened embeddings (f32 or bf16)
    w2_ref:    [B, W]    constant attention-weighted context (W = 2*enc_hidden)
    h0_ref:    [B, H]    initial hidden
    wih_e_ref: [E, G]    fused input weights (embedding part), gates packed on
                         lanes: [0:H)=r, [H:2H)=z, [2H:3H)=n, rest zero pad
    wih_w_ref: [W, G]    fused input weights (context part)
    whh_ref:   [H, G]    fused recurrent weights
    bih_ref:   [1, G]    fused input bias
    bhh_ref:   [1, G]    fused recurrent bias
    out_ref:   [T, B, H] per-step hidden states (resident; one HBM writeback)
    gi_ref:    [T, B, G] VMEM scratch: hoisted, gate-packed input projection
    """
    T, B, H = out_ref.shape
    G = gi_ref.shape[-1]

    # ---- Prologue (hoisted + fused): a single batched MXU pass over all
    # timesteps and all three gates; constant context term + b_ih computed
    # once.  Stores are lane-dense (G is a multiple of 128). ----
    const = jnp.dot(w2_ref[...], wih_w_ref[...],
                    preferred_element_type=jnp.float32) + bih_ref[...]       # [B, G]
    proj = jnp.dot(emb_ref[...], wih_e_ref[...],
                   preferred_element_type=jnp.float32)                       # [T*B, G]
    gi_ref[...] = proj.reshape(T, B, G) + const[None]

    # Loop-invariant recurrent weights / bias hoisted out of the serial loop.
    whh = whh_ref[...]                                                       # [H, G]
    bhh = bhh_ref[...]                                                       # [1, G]

    # ---- Serial recurrence: ONE fused h @ W_hh matmul per step (single MXU
    # weight tile instead of three push/pop chains); the gate split is static
    # lane slicing on VPU/XLU slots, off the MXU critical path. ----
    def step(t, h):
        gh = jnp.dot(h, whh, preferred_element_type=jnp.float32) + bhh       # [B, G]
        gi_t = gi_ref[t]                                                     # [B, G]
        # PyTorch GRU gate order (r, z, n); b_hh_n stays inside r * gh_n.
        r = jax.nn.sigmoid(gi_t[:, 0:H] + gh[:, 0:H])
        z = jax.nn.sigmoid(gi_t[:, H:2 * H] + gh[:, H:2 * H])
        n = jnp.tanh(gi_t[:, 2 * H:3 * H] + r * gh[:, 2 * H:3 * H])
        h_new = n + z * (h - n)                  # == (1-z)*n + z*h
        out_ref[t] = h_new.astype(out_ref.dtype)
        return h_new

    # Capped unroll: cross-step LLO visibility without code/compile blowup.
    jax.lax.fori_loop(0, T, step, h0_ref[...], unroll=min(T, 8))


def copy_net_decoder_forward(params, ctx, ctx_lengths, y, y_lengths, hid, weighted,
                             *, project_in_bf16=False):
    """Mirrors CopyNetDecoder.forward; ctx / ctx_lengths / y_lengths are unused
    by the reference loop (kept for signature fidelity)."""
    del ctx, ctx_lengths, y_lengths

    B, T = y.shape
    emb_tm = params["embed"][y.T]                     # [T, B, E]  time-major gather
    E = emb_tm.shape[-1]
    emb_flat = emb_tm.reshape(T * B, E)
    w2 = weighted[:, 0, :]                            # [B, 2*encH]
    h0 = hid[0]                                       # [B, H]
    H = h0.shape[-1]
    W = w2.shape[-1]
    G = ((3 * H + 127) // 128) * 128                  # gate-packed lane width

    # Fused, gate-packed, transposed weight layout (PyTorch rows are r,z,n).
    wih = params["gru_w_ih"]                          # [3H, E+W]
    pad2 = ((0, 0), (0, G - 3 * H))
    wih_e = jnp.pad(jnp.transpose(wih[:, :E]), pad2)              # [E, G]
    wih_w = jnp.pad(jnp.transpose(wih[:, E:]), pad2)              # [W, G]
    whh = jnp.pad(jnp.transpose(params["gru_w_hh"]), pad2)        # [H, G]
    bih = jnp.pad(params["gru_b_ih"], (0, G - 3 * H)).reshape(1, G)
    bhh = jnp.pad(params["gru_b_hh"], (0, G - 3 * H)).reshape(1, G)

    if project_in_bf16:
        # bf16 MXU inputs for the throughput-heavy hoisted projection only;
        # accumulation and everything else stays f32.
        emb_flat = emb_flat.astype(jnp.bfloat16)
        wih_e = wih_e.astype(jnp.bfloat16)

    vmem = pl.BlockSpec(memory_space=pltpu.MemorySpace.VMEM)
    out_tm = pl.pallas_call(
        _copy_net_gru_kernel,
        out_shape=jax.ShapeDtypeStruct((T, B, H), jnp.float32),
        in_specs=[vmem] * 8,                          # full arrays in VMEM, no pipelining
        out_specs=vmem,
        scratch_shapes=[pltpu.VMEM((T, B, G), jnp.float32)],      # gate-packed gi
        compiler_params=pltpu.CompilerParams(
            vmem_limit_bytes=32 * 1024 * 1024),
    )(emb_flat, w2, h0, wih_e, wih_w, whh, bih, bhh)

    out_bt = jnp.transpose(out_tm, (1, 0, 2))         # [B, T, H] (batch_first)
    hid_final = out_tm[T - 1][None]                   # [1, B, H] (last step's hidden)
    return out_bt, hid_final


def reference_forward(params, y, hid, weighted):
    """Pure-JAX reference of the same loop (PyTorch GRU cell semantics)."""
    emb = params["embed"][y]
    h = hid[0]
    w2 = weighted[:, 0, :]
    H = h.shape[-1]

    def step(h, x_t):
        x = jnp.concatenate([x_t, w2], axis=-1)
        gi = x @ params["gru_w_ih"].T + params["gru_b_ih"]
        gh = h @ params["gru_w_hh"].T + params["gru_b_hh"]
        r = jax.nn.sigmoid(gi[:, :H] + gh[:, :H])
        z = jax.nn.sigmoid(gi[:, H:2 * H] + gh[:, H:2 * H])
        n = jnp.tanh(gi[:, 2 * H:] + r * gh[:, 2 * H:])
        h_new = (1.0 - z) * n + z * h
        return h_new, h_new

    h_final, outs = jax.lax.scan(step, h, jnp.transpose(emb, (1, 0, 2)))
    return jnp.transpose(outs, (1, 0, 2)), h_final[None]


def init_params(key, vocab_size, embed_size, enc_hidden_size, dec_hidden_size):
    H = dec_hidden_size
    in_size = 2 * enc_hidden_size + embed_size
    k = 1.0 / np.sqrt(H)
    keys = jax.random.split(key, 8)
    u = lambda kk, shape, s: jax.random.uniform(kk, shape, jnp.float32, -s, s)
    return {
        "embed": jax.random.normal(keys[0], (vocab_size, embed_size), jnp.float32),
        "gru_w_ih": u(keys[1], (3 * H, in_size), k),
        "gru_w_hh": u(keys[2], (3 * H, H), k),
        "gru_b_ih": u(keys[3], (3 * H,), k),
        "gru_b_hh": u(keys[4], (3 * H,), k),
        # The following CopyNetDecoder submodules exist but are never used by
        # the reference forward (out, Wo, Wc, dropout, tanh) — created for
        # parameter-shape fidelity only.
        "out_w": u(keys[5], (vocab_size, H), k),
        "Wo_w": u(keys[6], (vocab_size, H), k),
        "Wc_w": u(keys[7], (H, 2 * enc_hidden_size), k),
    }


if __name__ == "__main__":
    vocab_size = 64
    embed_size = 32
    enc_hidden_size = 16       # -> 2*enc_hidden = 32
    dec_hidden_size = 32
    B, T, S = 8, 8, 8

    root = jax.random.PRNGKey(0)
    kp, ky, kh, kw, kc = jax.random.split(root, 5)

    params = init_params(kp, vocab_size, embed_size, enc_hidden_size, dec_hidden_size)

    y = jax.random.randint(ky, (B, T), 0, vocab_size, dtype=jnp.int32)
    y_lengths = jnp.full((B,), T, dtype=jnp.int32)
    ctx = jax.random.normal(kc, (B, S, 2 * enc_hidden_size), jnp.float32)   # unused by forward
    ctx_lengths = jnp.full((B,), S, dtype=jnp.int32)                        # unused by forward
    hid = jax.random.normal(kh, (1, B, dec_hidden_size), jnp.float32)
    weighted = jax.random.normal(kw, (B, 1, 2 * enc_hidden_size), jnp.float32)

    out_ref, hid_ref = reference_forward(params, y, hid, weighted)

    # Default (all-f32) path: bit-for-bit-ish parity with the f32 reference.
    out, hid_final = copy_net_decoder_forward(
        params, ctx, ctx_lengths, y, y_lengths, hid, weighted)
    out = jax.block_until_ready(out)
    hid_final = jax.block_until_ready(hid_final)
    np.testing.assert_allclose(np.asarray(out), np.asarray(out_ref), rtol=1e-4, atol=1e-4)
    np.testing.assert_allclose(np.asarray(hid_final), np.asarray(hid_ref), rtol=1e-4, atol=1e-4)

    # bf16-MXU-input path for the hoisted projection (v6e/v7x native MXU rate);
    # recurrence/activations stay f32, so only the projection precision drops.
    out_bf, hid_bf = copy_net_decoder_forward(
        params, ctx, ctx_lengths, y, y_lengths, hid, weighted, project_in_bf16=True)
    out_bf = jax.block_until_ready(out_bf)
    hid_bf = jax.block_until_ready(hid_bf)
    np.testing.assert_allclose(np.asarray(out_bf), np.asarray(out_ref), rtol=5e-2, atol=3e-2)
    np.testing.assert_allclose(np.asarray(hid_bf), np.asarray(hid_ref), rtol=5e-2, atol=3e-2)

    # TODO(synk): reference forward() returns None (truncated source); kernel returns the
    # per-step GRU outputs and final hidden that the loop actually computes.
    print("KERNEL_OK")
</pallas_src>

<mosaic_0001>
module attributes {stable_mosaic.version = 11 : i64} {
  func.func @_copy_net_gru_kernel(%arg0: memref<64x32xf32, #tpu.memory_space<vmem>>, %arg1: memref<8x32xf32, #tpu.memory_space<vmem>>, %arg2: memref<8x32xf32, #tpu.memory_space<vmem>>, %arg3: memref<32x128xf32, #tpu.memory_space<vmem>>, %arg4: memref<32x128xf32, #tpu.memory_space<vmem>>, %arg5: memref<32x128xf32, #tpu.memory_space<vmem>>, %arg6: memref<1x128xf32, #tpu.memory_space<vmem>>, %arg7: memref<1x128xf32, #tpu.memory_space<vmem>>, %arg8: memref<8x8x32xf32, #tpu.memory_space<vmem>>, %arg9: memref<8x8x128xf32, #tpu.memory_space<vmem>>) attributes {dimension_semantics = [], scalar_prefetch = 0 : i64, scratch_operands = 1 : i64, tpu.core_type = #tpu.core_type<tc>} {
    %c0 = arith.constant 0 : index
    %c0_0 = arith.constant 0 : index
    %0 = vector.load %arg1[%c0, %c0_0] : memref<8x32xf32, #tpu.memory_space<vmem>>, vector<8x32xf32>
    %c0_1 = arith.constant 0 : index
    %c0_2 = arith.constant 0 : index
    %1 = vector.load %arg4[%c0_1, %c0_2] : memref<32x128xf32, #tpu.memory_space<vmem>>, vector<32x128xf32>
    %cst = arith.constant dense<0.000000e+00> : vector<8x128xf32>
    %2 = tpu.matmul %0, %1, %cst {dimension_numbers = #tpu.dot_dimension_numbers<[1], [0], [0], [1], [0, 0, 1, 1], [], []>} : vector<8x32xf32>, vector<32x128xf32>, vector<8x128xf32> -> vector<8x128xf32>
    %c0_3 = arith.constant 0 : index
    %c0_4 = arith.constant 0 : index
    %3 = vector.load %arg6[%c0_3, %c0_4] : memref<1x128xf32, #tpu.memory_space<vmem>>, vector<1x128xf32>
    %4 = vector.broadcast %3 : vector<1x128xf32> to vector<8x128xf32>
    %5 = arith.addf %2, %4 : vector<8x128xf32>
    %c0_5 = arith.constant 0 : index
    %c0_6 = arith.constant 0 : index
    %6 = vector.load %arg0[%c0_5, %c0_6] : memref<64x32xf32, #tpu.memory_space<vmem>>, vector<64x32xf32>
    %c0_7 = arith.constant 0 : index
    %c0_8 = arith.constant 0 : index
    %7 = vector.load %arg3[%c0_7, %c0_8] : memref<32x128xf32, #tpu.memory_space<vmem>>, vector<32x128xf32>
    %cst_9 = arith.constant dense<0.000000e+00> : vector<64x128xf32>
    %8 = tpu.matmul %6, %7, %cst_9 {dimension_numbers = #tpu.dot_dimension_numbers<[1], [0], [0], [1], [0, 0, 1, 1], [], []>} : vector<64x32xf32>, vector<32x128xf32>, vector<64x128xf32> -> vector<64x128xf32>
    %9 = vector.shape_cast %8 : vector<64x128xf32> to vector<8x8x128xf32>
    %10 = vector.shape_cast %5 : vector<8x128xf32> to vector<1x8x128xf32>
    %11 = vector.broadcast %10 : vector<1x8x128xf32> to vector<8x8x128xf32>
    %12 = arith.addf %9, %11 : vector<8x8x128xf32>
    %c0_10 = arith.constant 0 : index
    %c0_11 = arith.constant 0 : index
    %c0_12 = arith.constant 0 : index
    %13 = vector.load %arg9[%c0_10, %c0_11, %c0_12] : memref<8x8x128xf32, #tpu.memory_space<vmem>>, vector<8x8x128xf32>
    tpu.vector_store %arg9[%c0_10, %c0_11, %c0_12], %12 {strides = array<i32>} : memref<8x8x128xf32, #tpu.memory_space<vmem>>, vector<8x8x128xf32>,
    %c0_13 = arith.constant 0 : index
    %c0_14 = arith.constant 0 : index
    %14 = vector.load %arg5[%c0_13, %c0_14] : memref<32x128xf32, #tpu.memory_space<vmem>>, vector<32x128xf32>
    %c0_15 = arith.constant 0 : index
    %c0_16 = arith.constant 0 : index
    %15 = vector.load %arg7[%c0_15, %c0_16] : memref<1x128xf32, #tpu.memory_space<vmem>>, vector<1x128xf32>
    %c0_17 = arith.constant 0 : index
    %c0_18 = arith.constant 0 : index
    %16 = vector.load %arg2[%c0_17, %c0_18] : memref<8x32xf32, #tpu.memory_space<vmem>>, vector<8x32xf32>
    %c0_i32 = arith.constant 0 : i32
    %cst_19 = arith.constant dense<0.000000e+00> : vector<8x128xf32>
    %17 = tpu.matmul %16, %14, %cst_19 {dimension_numbers = #tpu.dot_dimension_numbers<[1], [0], [0], [1], [0, 0, 1, 1], [], []>} : vector<8x32xf32>, vector<32x128xf32>, vector<8x128xf32> -> vector<8x128xf32>
    %18 = vector.broadcast %15 : vector<1x128xf32> to vector<8x128xf32>
    %19 = arith.addf %17, %18 : vector<8x128xf32>
    %20 = arith.index_cast %c0_i32 : i32 to index
    %c0_20 = arith.constant 0 : index
    %c0_21 = arith.constant 0 : index
    %21 = vector.load %arg9[%20, %c0_20, %c0_21] : memref<8x8x128xf32, #tpu.memory_space<vmem>>, vector<1x8x128xf32>
    %22 = vector.shape_cast %21 : vector<1x8x128xf32> to vector<8x128xf32>
    %23 = vector.extract_strided_slice %22 {offsets = [0, 0], sizes = [8, 32], strides = [1, 1]} : vector<8x128xf32> to vector<8x32xf32>
    %24 = vector.extract_strided_slice %19 {offsets = [0, 0], sizes = [8, 32], strides = [1, 1]} : vector<8x128xf32> to vector<8x32xf32>
    %25 = arith.addf %23, %24 : vector<8x32xf32>
    %26 = arith.negf %25 : vector<8x32xf32>
    %27 = math.exp %26 : vector<8x32xf32>
    %cst_22 = arith.constant 1.000000e+00 : f32
    %28 = vector.broadcast %cst_22 : f32 to vector<8x32xf32>
    %29 = arith.addf %28, %27 : vector<8x32xf32>
    %30 = arith.divf %28, %29 : vector<8x32xf32>
    %31 = vector.extract_strided_slice %22 {offsets = [0, 32], sizes = [8, 32], strides = [1, 1]} : vector<8x128xf32> to vector<8x32xf32>
    %32 = vector.extract_strided_slice %19 {offsets = [0, 32], sizes = [8, 32], strides = [1, 1]} : vector<8x128xf32> to vector<8x32xf32>
    %33 = arith.addf %31, %32 : vector<8x32xf32>
    %34 = arith.negf %33 : vector<8x32xf32>
    %35 = math.exp %34 : vector<8x32xf32>
    %cst_23 = arith.constant 1.000000e+00 : f32
    %36 = vector.broadcast %cst_23 : f32 to vector<8x32xf32>
    %37 = arith.addf %36, %35 : vector<8x32xf32>
    %38 = arith.divf %36, %37 : vector<8x32xf32>
    %39 = vector.extract_strided_slice %22 {offsets = [0, 64], sizes = [8, 32], strides = [1, 1]} : vector<8x128xf32> to vector<8x32xf32>
    %40 = vector.extract_strided_slice %19 {offsets = [0, 64], sizes = [8, 32], strides = [1, 1]} : vector<8x128xf32> to vector<8x32xf32>
    %41 = arith.mulf %30, %40 : vector<8x32xf32>
    %42 = arith.addf %39, %41 : vector<8x32xf32>
    %43 = math.tanh %42 : vector<8x32xf32>
    %44 = arith.subf %16, %43 : vector<8x32xf32>
    %45 = arith.mulf %38, %44 : vector<8x32xf32>
    %46 = arith.addf %43, %45 : vector<8x32xf32>
    %47 = arith.index_cast %c0_i32 : i32 to index
    %c0_24 = arith.constant 0 : index
    %c0_25 = arith.constant 0 : index
    %48 = vector.load %arg8[%47, %c0_24, %c0_25] : memref<8x8x32xf32, #tpu.memory_space<vmem>>, vector<1x8x32xf32>
    %49 = vector.shape_cast %48 : vector<1x8x32xf32> to vector<8x32xf32>
    %50 = vector.shape_cast %46 : vector<8x32xf32> to vector<1x8x32xf32>
    tpu.vector_store %arg8[%47, %c0_24, %c0_25], %50 {strides = array<i32>} : memref<8x8x32xf32, #tpu.memory_space<vmem>>, vector<1x8x32xf32>,
    %c1_i32 = arith.constant 1 : i32
    %cst_26 = arith.constant dense<0.000000e+00> : vector<8x128xf32>
    %51 = tpu.matmul %46, %14, %cst_26 {dimension_numbers = #tpu.dot_dimension_numbers<[1], [0], [0], [1], [0, 0, 1, 1], [], []>} : vector<8x32xf32>, vector<32x128xf32>, vector<8x128xf32> -> vector<8x128xf32>
    %52 = vector.broadcast %15 : vector<1x128xf32> to vector<8x128xf32>
    %53 = arith.addf %51, %52 : vector<8x128xf32>
    %54 = arith.index_cast %c1_i32 : i32 to index
    %c0_27 = arith.constant 0 : index
    %c0_28 = arith.constant 0 : index
    %55 = vector.load %arg9[%54, %c0_27, %c0_28] : memref<8x8x128xf32, #tpu.memory_space<vmem>>, vector<1x8x128xf32>
    %56 = vector.shape_cast %55 : vector<1x8x128xf32> to vector<8x128xf32>
    %57 = vector.extract_strided_slice %56 {offsets = [0, 0], sizes = [8, 32], strides = [1, 1]} : vector<8x128xf32> to vector<8x32xf32>
    %58 = vector.extract_strided_slice %53 {offsets = [0, 0], sizes = [8, 32], strides = [1, 1]} : vector<8x128xf32> to vector<8x32xf32>
    %59 = arith.addf %57, %58 : vector<8x32xf32>
    %60 = arith.negf %59 : vector<8x32xf32>
    %61 = math.exp %60 : vector<8x32xf32>
    %cst_29 = arith.constant 1.000000e+00 : f32
    %62 = vector.broadcast %cst_29 : f32 to vector<8x32xf32>
    %63 = arith.addf %62, %61 : vector<8x32xf32>
    %64 = arith.divf %62, %63 : vector<8x32xf32>
    %65 = vector.extract_strided_slice %56 {offsets = [0, 32], sizes = [8, 32], strides = [1, 1]} : vector<8x128xf32> to vector<8x32xf32>
    %66 = vector.extract_strided_slice %53 {offsets = [0, 32], sizes = [8, 32], strides = [1, 1]} : vector<8x128xf32> to vector<8x32xf32>
    %67 = arith.addf %65, %66 : vector<8x32xf32>
    %68 = arith.negf %67 : vector<8x32xf32>
    %69 = math.exp %68 : vector<8x32xf32>
    %cst_30 = arith.constant 1.000000e+00 : f32
    %70 = vector.broadcast %cst_30 : f32 to vector<8x32xf32>
    %71 = arith.addf %70, %69 : vector<8x32xf32>
    %72 = arith.divf %70, %71 : vector<8x32xf32>
    %73 = vector.extract_strided_slice %56 {offsets = [0, 64], sizes = [8, 32], strides = [1, 1]} : vector<8x128xf32> to vector<8x32xf32>
    %74 = vector.extract_strided_slice %53 {offsets = [0, 64], sizes = [8, 32], strides = [1, 1]} : vector<8x128xf32> to vector<8x32xf32>
    %75 = arith.mulf %64, %74 : vector<8x32xf32>
    %76 = arith.addf %73, %75 : vector<8x32xf32>
    %77 = math.tanh %76 : vector<8x32xf32>
    %78 = arith.subf %46, %77 : vector<8x32xf32>
    %79 = arith.mulf %72, %78 : vector<8x32xf32>
    %80 = arith.addf %77, %79 : vector<8x32xf32>
    %81 = arith.index_cast %c1_i32 : i32 to index
    %c0_31 = arith.constant 0 : index
    %c0_32 = arith.constant 0 : index
    %82 = vector.load %arg8[%81, %c0_31, %c0_32] : memref<8x8x32xf32, #tpu.memory_space<vmem>>, vector<1x8x32xf32>
    %83 = vector.shape_cast %82 : vector<1x8x32xf32> to vector<8x32xf32>
    %84 = vector.shape_cast %80 : vector<8x32xf32> to vector<1x8x32xf32>
    tpu.vector_store %arg8[%81, %c0_31, %c0_32], %84 {strides = array<i32>} : memref<8x8x32xf32, #tpu.memory_space<vmem>>, vector<1x8x32xf32>,
    %c2_i32 = arith.constant 2 : i32
    %cst_33 = arith.constant dense<0.000000e+00> : vector<8x128xf32>
    %85 = tpu.matmul %80, %14, %cst_33 {dimension_numbers = #tpu.dot_dimension_numbers<[1], [0], [0], [1], [0, 0, 1, 1], [], []>} : vector<8x32xf32>, vector<32x128xf32>, vector<8x128xf32> -> vector<8x128xf32>
    %86 = vector.broadcast %15 : vector<1x128xf32> to vector<8x128xf32>
    %87 = arith.addf %85, %86 : vector<8x128xf32>
    %88 = arith.index_cast %c2_i32 : i32 to index
    %c0_34 = arith.constant 0 : index
    %c0_35 = arith.constant 0 : index
    %89 = vector.load %arg9[%88, %c0_34, %c0_35] : memref<8x8x128xf32, #tpu.memory_space<vmem>>, vector<1x8x128xf32>
    %90 = vector.shape_cast %89 : vector<1x8x128xf32> to vector<8x128xf32>
    %91 = vector.extract_strided_slice %90 {offsets = [0, 0], sizes = [8, 32], strides = [1, 1]} : vector<8x128xf32> to vector<8x32xf32>
    %92 = vector.extract_strided_slice %87 {offsets = [0, 0], sizes = [8, 32], strides = [1, 1]} : vector<8x128xf32> to vector<8x32xf32>
    %93 = arith.addf %91, %92 : vector<8x32xf32>
    %94 = arith.negf %93 : vector<8x32xf32>
    %95 = math.exp %94 : vector<8x32xf32>
    %cst_36 = arith.constant 1.000000e+00 : f32
    %96 = vector.broadcast %cst_36 : f32 to vector<8x32xf32>
    %97 = arith.addf %96, %95 : vector<8x32xf32>
    %98 = arith.divf %96, %97 : vector<8x32xf32>
    %99 = vector.extract_strided_slice %90 {offsets = [0, 32], sizes = [8, 32], strides = [1, 1]} : vector<8x128xf32> to vector<8x32xf32>
    %100 = vector.extract_strided_slice %87 {offsets = [0, 32], sizes = [8, 32], strides = [1, 1]} : vector<8x128xf32> to vector<8x32xf32>
    %101 = arith.addf %99, %100 : vector<8x32xf32>
    %102 = arith.negf %101 : vector<8x32xf32>
    %103 = math.exp %102 : vector<8x32xf32>
    %cst_37 = arith.constant 1.000000e+00 : f32
    %104 = vector.broadcast %cst_37 : f32 to vector<8x32xf32>
    %105 = arith.addf %104, %103 : vector<8x32xf32>
    %106 = arith.divf %104, %105 : vector<8x32xf32>
    %107 = vector.extract_strided_slice %90 {offsets = [0, 64], sizes = [8, 32], strides = [1, 1]} : vector<8x128xf32> to vector<8x32xf32>
    %108 = vector.extract_strided_slice %87 {offsets = [0, 64], sizes = [8, 32], strides = [1, 1]} : vector<8x128xf32> to vector<8x32xf32>
    %109 = arith.mulf %98, %108 : vector<8x32xf32>
    %110 = arith.addf %107, %109 : vector<8x32xf32>
    %111 = math.tanh %110 : vector<8x32xf32>
    %112 = arith.subf %80, %111 : vector<8x32xf32>
    %113 = arith.mulf %106, %112 : vector<8x32xf32>
    %114 = arith.addf %111, %113 : vector<8x32xf32>
    %115 = arith.index_cast %c2_i32 : i32 to index
    %c0_38 = arith.constant 0 : index
    %c0_39 = arith.constant 0 : index
    %116 = vector.load %arg8[%115, %c0_38, %c0_39] : memref<8x8x32xf32, #tpu.memory_space<vmem>>, vector<1x8x32xf32>
    %117 = vector.shape_cast %116 : vector<1x8x32xf32> to vector<8x32xf32>
    %118 = vector.shape_cast %114 : vector<8x32xf32> to vector<1x8x32xf32>
    tpu.vector_store %arg8[%115, %c0_38, %c0_39], %118 {strides = array<i32>} : memref<8x8x32xf32, #tpu.memory_space<vmem>>, vector<1x8x32xf32>,
    %c3_i32 = arith.constant 3 : i32
    %cst_40 = arith.constant dense<0.000000e+00> : vector<8x128xf32>
    %119 = tpu.matmul %114, %14, %cst_40 {dimension_numbers = #tpu.dot_dimension_numbers<[1], [0], [0], [1], [0, 0, 1, 1], [], []>} : vector<8x32xf32>, vector<32x128xf32>, vector<8x128xf32> -> vector<8x128xf32>
    %120 = vector.broadcast %15 : vector<1x128xf32> to vector<8x128xf32>
    %121 = arith.addf %119, %120 : vector<8x128xf32>
    %122 = arith.index_cast %c3_i32 : i32 to index
    %c0_41 = arith.constant 0 : index
    %c0_42 = arith.constant 0 : index
    %123 = vector.load %arg9[%122, %c0_41, %c0_42] : memref<8x8x128xf32, #tpu.memory_space<vmem>>, vector<1x8x128xf32>
    %124 = vector.shape_cast %123 : vector<1x8x128xf32> to vector<8x128xf32>
    %125 = vector.extract_strided_slice %124 {offsets = [0, 0], sizes = [8, 32], strides = [1, 1]} : vector<8x128xf32> to vector<8x32xf32>
    %126 = vector.extract_strided_slice %121 {offsets = [0, 0], sizes = [8, 32], strides = [1, 1]} : vector<8x128xf32> to vector<8x32xf32>
    %127 = arith.addf %125, %126 : vector<8x32xf32>
    %128 = arith.negf %127 : vector<8x32xf32>
    %129 = math.exp %128 : vector<8x32xf32>
    %cst_43 = arith.constant 1.000000e+00 : f32
    %130 = vector.broadcast %cst_43 : f32 to vector<8x32xf32>
    %131 = arith.addf %130, %129 : vector<8x32xf32>
    %132 = arith.divf %130, %131 : vector<8x32xf32>
    %133 = vector.extract_strided_slice %124 {offsets = [0, 32], sizes = [8, 32], strides = [1, 1]} : vector<8x128xf32> to vector<8x32xf32>
    %134 = vector.extract_strided_slice %121 {offsets = [0, 32], sizes = [8, 32], strides = [1, 1]} : vector<8x128xf32> to vector<8x32xf32>
    %135 = arith.addf %133, %134 : vector<8x32xf32>
    %136 = arith.negf %135 : vector<8x32xf32>
    %137 = math.exp %136 : vector<8x32xf32>
    %cst_44 = arith.constant 1.000000e+00 : f32
    %138 = vector.broadcast %cst_44 : f32 to vector<8x32xf32>
    %139 = arith.addf %138, %137 : vector<8x32xf32>
    %140 = arith.divf %138, %139 : vector<8x32xf32>
    %141 = vector.extract_strided_slice %124 {offsets = [0, 64], sizes = [8, 32], strides = [1, 1]} : vector<8x128xf32> to vector<8x32xf32>
    %142 = vector.extract_strided_slice %121 {offsets = [0, 64], sizes = [8, 32], strides = [1, 1]} : vector<8x128xf32> to vector<8x32xf32>
    %143 = arith.mulf %132, %142 : vector<8x32xf32>
    %144 = arith.addf %141, %143 : vector<8x32xf32>
    %145 = math.tanh %144 : vector<8x32xf32>
    %146 = arith.subf %114, %145 : vector<8x32xf32>
    %147 = arith.mulf %140, %146 : vector<8x32xf32>
    %148 = arith.addf %145, %147 : vector<8x32xf32>
    %149 = arith.index_cast %c3_i32 : i32 to index
    %c0_45 = arith.constant 0 : index
    %c0_46 = arith.constant 0 : index
    %150 = vector.load %arg8[%149, %c0_45, %c0_46] : memref<8x8x32xf32, #tpu.memory_space<vmem>>, vector<1x8x32xf32>
    %151 = vector.shape_cast %150 : vector<1x8x32xf32> to vector<8x32xf32>
    %152 = vector.shape_cast %148 : vector<8x32xf32> to vector<1x8x32xf32>
    tpu.vector_store %arg8[%149, %c0_45, %c0_46], %152 {strides = array<i32>} : memref<8x8x32xf32, #tpu.memory_space<vmem>>, vector<1x8x32xf32>,
    %c4_i32 = arith.constant 4 : i32
    %cst_47 = arith.constant dense<0.000000e+00> : vector<8x128xf32>
    %153 = tpu.matmul %148, %14, %cst_47 {dimension_numbers = #tpu.dot_dimension_numbers<[1], [0], [0], [1], [0, 0, 1, 1], [], []>} : vector<8x32xf32>, vector<32x128xf32>, vector<8x128xf32> -> vector<8x128xf32>
    %154 = vector.broadcast %15 : vector<1x128xf32> to vector<8x128xf32>
    %155 = arith.addf %153, %154 : vector<8x128xf32>
    %156 = arith.index_cast %c4_i32 : i32 to index
    %c0_48 = arith.constant 0 : index
    %c0_49 = arith.constant 0 : index
    %157 = vector.load %arg9[%156, %c0_48, %c0_49] : memref<8x8x128xf32, #tpu.memory_space<vmem>>, vector<1x8x128xf32>
    %158 = vector.shape_cast %157 : vector<1x8x128xf32> to vector<8x128xf32>
    %159 = vector.extract_strided_slice %158 {offsets = [0, 0], sizes = [8, 32], strides = [1, 1]} : vector<8x128xf32> to vector<8x32xf32>
    %160 = vector.extract_strided_slice %155 {offsets = [0, 0], sizes = [8, 32], strides = [1, 1]} : vector<8x128xf32> to vector<8x32xf32>
    %161 = arith.addf %159, %160 : vector<8x32xf32>
    %162 = arith.negf %161 : vector<8x32xf32>
    %163 = math.exp %162 : vector<8x32xf32>
    %cst_50 = arith.constant 1.000000e+00 : f32
    %164 = vector.broadcast %cst_50 : f32 to vector<8x32xf32>
    %165 = arith.addf %164, %163 : vector<8x32xf32>
    %166 = arith.divf %164, %165 : vector<8x32xf32>
    %167 = vector.extract_strided_slice %158 {offsets = [0, 32], sizes = [8, 32], strides = [1, 1]} : vector<8x128xf32> to vector<8x32xf32>
    %168 = vector.extract_strided_slice %155 {offsets = [0, 32], sizes = [8, 32], strides = [1, 1]} : vector<8x128xf32> to vector<8x32xf32>
    %169 = arith.addf %167, %168 : vector<8x32xf32>
    %170 = arith.negf %169 : vector<8x32xf32>
    %171 = math.exp %170 : vector<8x32xf32>
    %cst_51 = arith.constant 1.000000e+00 : f32
    %172 = vector.broadcast %cst_51 : f32 to vector<8x32xf32>
    %173 = arith.addf %172, %171 : vector<8x32xf32>
    %174 = arith.divf %172, %173 : vector<8x32xf32>
    %175 = vector.extract_strided_slice %158 {offsets = [0, 64], sizes = [8, 32], strides = [1, 1]} : vector<8x128xf32> to vector<8x32xf32>
    %176 = vector.extract_strided_slice %155 {offsets = [0, 64], sizes = [8, 32], strides = [1, 1]} : vector<8x128xf32> to vector<8x32xf32>
    %177 = arith.mulf %166, %176 : vector<8x32xf32>
    %178 = arith.addf %175, %177 : vector<8x32xf32>
    %179 = math.tanh %178 : vector<8x32xf32>
    %180 = arith.subf %148, %179 : vector<8x32xf32>
    %181 = arith.mulf %174, %180 : vector<8x32xf32>
    %182 = arith.addf %179, %181 : vector<8x32xf32>
    %183 = arith.index_cast %c4_i32 : i32 to index
    %c0_52 = arith.constant 0 : index
    %c0_53 = arith.constant 0 : index
    %184 = vector.load %arg8[%183, %c0_52, %c0_53] : memref<8x8x32xf32, #tpu.memory_space<vmem>>, vector<1x8x32xf32>
    %185 = vector.shape_cast %184 : vector<1x8x32xf32> to vector<8x32xf32>
    %186 = vector.shape_cast %182 : vector<8x32xf32> to vector<1x8x32xf32>
    tpu.vector_store %arg8[%183, %c0_52, %c0_53], %186 {strides = array<i32>} : memref<8x8x32xf32, #tpu.memory_space<vmem>>, vector<1x8x32xf32>,
    %c5_i32 = arith.constant 5 : i32
    %cst_54 = arith.constant dense<0.000000e+00> : vector<8x128xf32>
    %187 = tpu.matmul %182, %14, %cst_54 {dimension_numbers = #tpu.dot_dimension_numbers<[1], [0], [0], [1], [0, 0, 1, 1], [], []>} : vector<8x32xf32>, vector<32x128xf32>, vector<8x128xf32> -> vector<8x128xf32>
    %188 = vector.broadcast %15 : vector<1x128xf32> to vector<8x128xf32>
    %189 = arith.addf %187, %188 : vector<8x128xf32>
    %190 = arith.index_cast %c5_i32 : i32 to index
    %c0_55 = arith.constant 0 : index
    %c0_56 = arith.constant 0 : index
    %191 = vector.load %arg9[%190, %c0_55, %c0_56] : memref<8x8x128xf32, #tpu.memory_space<vmem>>, vector<1x8x128xf32>
    %192 = vector.shape_cast %191 : vector<1x8x128xf32> to vector<8x128xf32>
    %193 = vector.extract_strided_slice %192 {offsets = [0, 0], sizes = [8, 32], strides = [1, 1]} : vector<8x128xf32> to vector<8x32xf32>
    %194 = vector.extract_strided_slice %189 {offsets = [0, 0], sizes = [8, 32], strides = [1, 1]} : vector<8x128xf32> to vector<8x32xf32>
    %195 = arith.addf %193, %194 : vector<8x32xf32>
    %196 = arith.negf %195 : vector<8x32xf32>
    %197 = math.exp %196 : vector<8x32xf32>
    %cst_57 = arith.constant 1.000000e+00 : f32
    %198 = vector.broadcast %cst_57 : f32 to vector<8x32xf32>
    %199 = arith.addf %198, %197 : vector<8x32xf32>
    %200 = arith.divf %198, %199 : vector<8x32xf32>
    %201 = vector.extract_strided_slice %192 {offsets = [0, 32], sizes = [8, 32], strides = [1, 1]} : vector<8x128xf32> to vector<8x32xf32>
    %202 = vector.extract_strided_slice %189 {offsets = [0, 32], sizes = [8, 32], strides = [1, 1]} : vector<8x128xf32> to vector<8x32xf32>
    %203 = arith.addf %201, %202 : vector<8x32xf32>
    %204 = arith.negf %203 : vector<8x32xf32>
    %205 = math.exp %204 : vector<8x32xf32>
    %cst_58 = arith.constant 1.000000e+00 : f32
    %206 = vector.broadcast %cst_58 : f32 to vector<8x32xf32>
    %207 = arith.addf %206, %205 : vector<8x32xf32>
    %208 = arith.divf %206, %207 : vector<8x32xf32>
    %209 = vector.extract_strided_slice %192 {offsets = [0, 64], sizes = [8, 32], strides = [1, 1]} : vector<8x128xf32> to vector<8x32xf32>
    %210 = vector.extract_strided_slice %189 {offsets = [0, 64], sizes = [8, 32], strides = [1, 1]} : vector<8x128xf32> to vector<8x32xf32>
    %211 = arith.mulf %200, %210 : vector<8x32xf32>
    %212 = arith.addf %209, %211 : vector<8x32xf32>
    %213 = math.tanh %212 : vector<8x32xf32>
    %214 = arith.subf %182, %213 : vector<8x32xf32>
    %215 = arith.mulf %208, %214 : vector<8x32xf32>
    %216 = arith.addf %213, %215 : vector<8x32xf32>
    %217 = arith.index_cast %c5_i32 : i32 to index
    %c0_59 = arith.constant 0 : index
    %c0_60 = arith.constant 0 : index
    %218 = vector.load %arg8[%217, %c0_59, %c0_60] : memref<8x8x32xf32, #tpu.memory_space<vmem>>, vector<1x8x32xf32>
    %219 = vector.shape_cast %218 : vector<1x8x32xf32> to vector<8x32xf32>
    %220 = vector.shape_cast %216 : vector<8x32xf32> to vector<1x8x32xf32>
    tpu.vector_store %arg8[%217, %c0_59, %c0_60], %220 {strides = array<i32>} : memref<8x8x32xf32, #tpu.memory_space<vmem>>, vector<1x8x32xf32>,
    %c6_i32 = arith.constant 6 : i32
    %cst_61 = arith.constant dense<0.000000e+00> : vector<8x128xf32>
    %221 = tpu.matmul %216, %14, %cst_61 {dimension_numbers = #tpu.dot_dimension_numbers<[1], [0], [0], [1], [0, 0, 1, 1], [], []>} : vector<8x32xf32>, vector<32x128xf32>, vector<8x128xf32> -> vector<8x128xf32>
    %222 = vector.broadcast %15 : vector<1x128xf32> to vector<8x128xf32>
    %223 = arith.addf %221, %222 : vector<8x128xf32>
    %224 = arith.index_cast %c6_i32 : i32 to index
    %c0_62 = arith.constant 0 : index
    %c0_63 = arith.constant 0 : index
    %225 = vector.load %arg9[%224, %c0_62, %c0_63] : memref<8x8x128xf32, #tpu.memory_space<vmem>>, vector<1x8x128xf32>
    %226 = vector.shape_cast %225 : vector<1x8x128xf32> to vector<8x128xf32>
    %227 = vector.extract_strided_slice %226 {offsets = [0, 0], sizes = [8, 32], strides = [1, 1]} : vector<8x128xf32> to vector<8x32xf32>
    %228 = vector.extract_strided_slice %223 {offsets = [0, 0], sizes = [8, 32], strides = [1, 1]} : vector<8x128xf32> to vector<8x32xf32>
    %229 = arith.addf %227, %228 : vector<8x32xf32>
    %230 = arith.negf %229 : vector<8x32xf32>
    %231 = math.exp %230 : vector<8x32xf32>
    %cst_64 = arith.constant 1.000000e+00 : f32
    %232 = vector.broadcast %cst_64 : f32 to vector<8x32xf32>
    %233 = arith.addf %232, %231 : vector<8x32xf32>
    %234 = arith.divf %232, %233 : vector<8x32xf32>
    %235 = vector.extract_strided_slice %226 {offsets = [0, 32], sizes = [8, 32], strides = [1, 1]} : vector<8x128xf32> to vector<8x32xf32>
    %236 = vector.extract_strided_slice %223 {offsets = [0, 32], sizes = [8, 32], strides = [1, 1]} : vector<8x128xf32> to vector<8x32xf32>
    %237 = arith.addf %235, %236 : vector<8x32xf32>
    %238 = arith.negf %237 : vector<8x32xf32>
    %239 = math.exp %238 : vector<8x32xf32>
    %cst_65 = arith.constant 1.000000e+00 : f32
    %240 = vector.broadcast %cst_65 : f32 to vector<8x32xf32>
    %241 = arith.addf %240, %239 : vector<8x32xf32>
    %242 = arith.divf %240, %241 : vector<8x32xf32>
    %243 = vector.extract_strided_slice %226 {offsets = [0, 64], sizes = [8, 32], strides = [1, 1]} : vector<8x128xf32> to vector<8x32xf32>
    %244 = vector.extract_strided_slice %223 {offsets = [0, 64], sizes = [8, 32], strides = [1, 1]} : vector<8x128xf32> to vector<8x32xf32>
    %245 = arith.mulf %234, %244 : vector<8x32xf32>
    %246 = arith.addf %243, %245 : vector<8x32xf32>
    %247 = math.tanh %246 : vector<8x32xf32>
    %248 = arith.subf %216, %247 : vector<8x32xf32>
    %249 = arith.mulf %242, %248 : vector<8x32xf32>
    %250 = arith.addf %247, %249 : vector<8x32xf32>
    %251 = arith.index_cast %c6_i32 : i32 to index
    %c0_66 = arith.constant 0 : index
    %c0_67 = arith.constant 0 : index
    %252 = vector.load %arg8[%251, %c0_66, %c0_67] : memref<8x8x32xf32, #tpu.memory_space<vmem>>, vector<1x8x32xf32>
    %253 = vector.shape_cast %252 : vector<1x8x32xf32> to vector<8x32xf32>
    %254 = vector.shape_cast %250 : vector<8x32xf32> to vector<1x8x32xf32>
    tpu.vector_store %arg8[%251, %c0_66, %c0_67], %254 {strides = array<i32>} : memref<8x8x32xf32, #tpu.memory_space<vmem>>, vector<1x8x32xf32>,
    %c7_i32 = arith.constant 7 : i32
    %cst_68 = arith.constant dense<0.000000e+00> : vector<8x128xf32>
    %255 = tpu.matmul %250, %14, %cst_68 {dimension_numbers = #tpu.dot_dimension_numbers<[1], [0], [0], [1], [0, 0, 1, 1], [], []>} : vector<8x32xf32>, vector<32x128xf32>, vector<8x128xf32> -> vector<8x128xf32>
    %256 = vector.broadcast %15 : vector<1x128xf32> to vector<8x128xf32>
    %257 = arith.addf %255, %256 : vector<8x128xf32>
    %258 = arith.index_cast %c7_i32 : i32 to index
    %c0_69 = arith.constant 0 : index
    %c0_70 = arith.constant 0 : index
    %259 = vector.load %arg9[%258, %c0_69, %c0_70] : memref<8x8x128xf32, #tpu.memory_space<vmem>>, vector<1x8x128xf32>
    %260 = vector.shape_cast %259 : vector<1x8x128xf32> to vector<8x128xf32>
    %261 = vector.extract_strided_slice %260 {offsets = [0, 0], sizes = [8, 32], strides = [1, 1]} : vector<8x128xf32> to vector<8x32xf32>
    %262 = vector.extract_strided_slice %257 {offsets = [0, 0], sizes = [8, 32], strides = [1, 1]} : vector<8x128xf32> to vector<8x32xf32>
    %263 = arith.addf %261, %262 : vector<8x32xf32>
    %264 = arith.negf %263 : vector<8x32xf32>
    %265 = math.exp %264 : vector<8x32xf32>
    %cst_71 = arith.constant 1.000000e+00 : f32
    %266 = vector.broadcast %cst_71 : f32 to vector<8x32xf32>
    %267 = arith.addf %266, %265 : vector<8x32xf32>
    %268 = arith.divf %266, %267 : vector<8x32xf32>
    %269 = vector.extract_strided_slice %260 {offsets = [0, 32], sizes = [8, 32], strides = [1, 1]} : vector<8x128xf32> to vector<8x32xf32>
    %270 = vector.extract_strided_slice %257 {offsets = [0, 32], sizes = [8, 32], strides = [1, 1]} : vector<8x128xf32> to vector<8x32xf32>
    %271 = arith.addf %269, %270 : vector<8x32xf32>
    %272 = arith.negf %271 : vector<8x32xf32>
    %273 = math.exp %272 : vector<8x32xf32>
    %cst_72 = arith.constant 1.000000e+00 : f32
    %274 = vector.broadcast %cst_72 : f32 to vector<8x32xf32>
    %275 = arith.addf %274, %273 : vector<8x32xf32>
    %276 = arith.divf %274, %275 : vector<8x32xf32>
    %277 = vector.extract_strided_slice %260 {offsets = [0, 64], sizes = [8, 32], strides = [1, 1]} : vector<8x128xf32> to vector<8x32xf32>
    %278 = vector.extract_strided_slice %257 {offsets = [0, 64], sizes = [8, 32], strides = [1, 1]} : vector<8x128xf32> to vector<8x32xf32>
    %279 = arith.mulf %268, %278 : vector<8x32xf32>
    %280 = arith.addf %277, %279 : vector<8x32xf32>
    %281 = math.tanh %280 : vector<8x32xf32>
    %282 = arith.subf %250, %281 : vector<8x32xf32>
    %283 = arith.mulf %276, %282 : vector<8x32xf32>
    %284 = arith.addf %281, %283 : vector<8x32xf32>
    %285 = arith.index_cast %c7_i32 : i32 to index
    %c0_73 = arith.constant 0 : index
    %c0_74 = arith.constant 0 : index
    %286 = vector.load %arg8[%285, %c0_73, %c0_74] : memref<8x8x32xf32, #tpu.memory_space<vmem>>, vector<1x8x32xf32>
    %287 = vector.shape_cast %286 : vector<1x8x32xf32> to vector<8x32xf32>
    %288 = vector.shape_cast %284 : vector<8x32xf32> to vector<1x8x32xf32>
    tpu.vector_store %arg8[%285, %c0_73, %c0_74], %288 {strides = array<i32>} : memref<8x8x32xf32, #tpu.memory_space<vmem>>, vector<1x8x32xf32>,
    %c8_i32 = arith.constant 8 : i32
    return
  }
}

</mosaic_0001>

<bundles_post_ra>
// kernel: tpu_custom_call.1
= control target key start
LH: loop header
LB: loop body
LE: loop exit
PB: predicated region body
PF: predicated region fallthrough
CT: control target
= control target key end

     0   :  { %13 = vsyncpa [#allocation4], 0  ;;  %s1920_s0 = inlined_call_operand.vmem [shape: f32[64,32], index: 0, kind: input, shape index: {}]   ;;  %s1921_s1 = inlined_call_operand.hbm [shape: f32[8,32], index: 1, kind: input, shape index: {}]   ;;  %s1922_s2 = inlined_call_operand.hbm [shape: f32[8,32], index: 2, kind: input, shape index: {}]   ;;  %s1923_s3 = inlined_call_operand.vmem [shape: f32[32,128], index: 3, kind: input, shape index: {}]   ;;  %s1924_s4 = inlined_call_operand.vmem [shape: f32[32,128], index: 4, kind: input, shape index: {}]   ;;  %s1925_s5 = inlined_call_operand.vmem [shape: f32[32,128], index: 5, kind: input, shape index: {}]   ;;  %s1926_s6 = inlined_call_operand.vmem [shape: f32[1,128], index: 6, kind: input, shape index: {}]   ;;  %s1927_s7 = inlined_call_operand.vmem [shape: f32[1,128], index: 7, kind: input, shape index: {}]   ;;  %s1928_s8 = inlined_call_operand.hbm [shape: f32[8,8,32], index: 8, kind: output, shape index: {}]  }
   0x1   :  { %14 = vsyncpa [#allocation7], 0 }
   0x2   :  { %15 = vsyncpa [#allocation5], 0  ;;  %s1598_s27 = smov [#allocation3]   ;;  %s1599_s29 = smov [#allocation6]  }
   0x3   :  { %s24_s28 = sshll.u32 %s1598_s27, 4  ;;  %s34_s30 = sshll.u32 %s1599_s29, 4  ;;  %s25_s28 = int_to_ptr.vmem [resolvable:$true] %s24_s28  ;;  %s35_s30 = int_to_ptr.vmem [resolvable:$true] %s34_s30 }
   0x4   :  { %s1526_s11 = scalar_lea.hbm %s1921_s1, 128 }
   0x5   :  { %p1527_p0 = scmp.ne.s32.totalorder %s1921_s1, %s1526_s11  ;;  %p1530_p1 = scmp.lt.u32.totalorder %s1526_s11, %s1921_s1 }
   0x7   :  { %p1532_p2 = pnand %p1530_p1, %p1527_p0 }
   0x9   :  { %1535 = shalt.err (!%p1532_p2)
}
   0xa   :  { %s1536_s16 = scalar_lea.vmem %s25_s28, 128  ;;  %p1541_p4 = scmp.lt.s32.totalorder %s25_s28, %s25_s28 }
   0xb   :  { %p1537_p3 = scmp.ne.s32.totalorder %s25_s28, %s1536_s16  ;;  %p1542_p5 = scmp.lt.s32.totalorder %s1536_s16, %s1536_s16 }
   0xd   :  { %p1543_p6 = por %p1542_p5, %p1541_p4 }
   0xf   :  { %p1544_p7 = pnand %p1543_p6, %p1537_p3 }
  0x11   :  { %1547 = shalt.err (!%p1544_p7)
}
  0x12   :  { %27 = dma.hbm_to_vmem [thread:$0]  %s1921_s1, 128, %s25_s28, [#allocation4]  }
  0x13   :  { %s1548_s21 = scalar_lea.hbm %s1922_s2, 128 }
  0x14   :  { %p1549_p8 = scmp.ne.s32.totalorder %s1922_s2, %s1548_s21  ;;  %p1552_p9 = scmp.lt.u32.totalorder %s1548_s21, %s1922_s2 }
  0x16   :  { %p1554_p10 = pnand %p1552_p9, %p1549_p8 }
  0x18   :  { %1557 = shalt.err (!%p1554_p10)
}
  0x19   :  { %s1558_s26 = scalar_lea.vmem %s35_s30, 128  ;;  %p1563_p12 = scmp.lt.s32.totalorder %s35_s30, %s35_s30 }
  0x1a   :  { %p1559_p11 = scmp.ne.s32.totalorder %s35_s30, %s1558_s26  ;;  %p1564_p13 = scmp.lt.s32.totalorder %s1558_s26, %s1558_s26 }
  0x1c   :  { %p1565_p0 = por %p1564_p13, %p1563_p12 }
  0x1e   :  { %p1566_p1 = pnand %p1565_p0, %p1559_p11 }
  0x20   :  { %1569 = shalt.err (!%p1566_p1)
}
  0x21   :  { %37 = dma.hbm_to_vmem [thread:$0]  %s1922_s2, 128, %s35_s30, [#allocation7]  }
  0x22   :  { %1592 = dma.done.wait [#allocation4], 128  }
  0x23   :  { %1593 = vsyncadd [#allocation4], 4294967168 }
  0x24   :  { %1594 = dma.done.wait [#allocation7], 128  }
  0x25   :  { %1595 = vsyncadd [#allocation7], 4294967168  ;;  %v1600_v0 = vmov 0.0|0.0   ;;  %vm1601_vm0 = vmmov 0   ;;  %v1602_v1 = vmov 0.0   ;;  %v55_v2 = vld [vmem:[%s1924_s4] sm:$0xff] }
  0x26   :  { %1405 = vmatprep.subr.bf16.mxu0 %v1600_v0  ;;  %1294 = vmatprep.mubr.msk.f32.mxu0 %vm1601_vm0, %v1602_v1  ;;  %v56_v3 = vld [vmem:[%s1924_s4 + $0x8] sm:$0xff]  ;;  %v148_v4 = vld [vmem:[%s1923_s3] sm:$0xff]  ;;  %v57_v7 = vld [vmem:[%s1924_s4 + $0x10] sm:$0xff]  ;;  %vm66_vm1 = vcmask 261120   ;;  %s1605_s21 = smov 96   ;;  %s1606_s22 = smov [#allocation8]  }
  0x27   :  { %v1406_v5 = vpack.c.bf16 %v56_v3, %v55_v2  ;;  %v149_v6 = vld [vmem:[%s1923_s3 + $0x8] sm:$0xff]  ;;  %v58_v8 = vld [vmem:[%s1924_s4 + $0x18] sm:$0xff]  ;;  %v150_v10 = vld [vmem:[%s1923_s3 + $0x10] sm:$0xff]  ;;  %s1189_s4 = sshll.u32 %s1606_s22, 4  ;;  %s1190_s4 = int_to_ptr.vmem [resolvable:$true] %s1189_s4 }
  0x28   :  { %v1411_v9 = vpack.c.bf16 %v149_v6, %v148_v4  ;;  %v151_v11 = vld [vmem:[%s1923_s3 + $0x18] sm:$0xff]  ;;  %v1409_v12 = vpack.c.bf16 %v58_v8, %v57_v7  ;;  %v140_v14 = vld [vmem:[%s1920_s0] sm:$0xff]  ;;  %v298_v16 = vld [vmem:[%s1925_s5 + $0x8] sm:$0xff]  ;;  %s1570_s23 = scalar_lea.vmem %s1190_s4, 1024  ;;  %p1575_p3 = scmp.lt.s32.totalorder %s1190_s4, %s1190_s4 }
  0x29   :  { %1407 = vmatpush3.bf16.msra.mxu0 %v1406_v5  ;;  %v1415_v13 = vpack.c.bf16 %v151_v11, %v150_v10  ;;  %v297_v15 = vld [vmem:[%s1925_s5] sm:$0xff]  ;;  %1305 = vmatprep.mubr.msk.f32.mxu1 %vm66_vm1, %v140_v14  ;;  %v299_v19 = vld [vmem:[%s1925_s5 + $0x10] sm:$0xff]  ;;  %v300_v20 = vld [vmem:[%s1925_s5 + $0x18] sm:$0xff]  ;;  %p1571_p2 = scmp.ne.s32.totalorder %s1190_s4, %s1570_s23  ;;  %p1576_p4 = scmp.lt.s32.totalorder %s1570_s23, %s1570_s23 }
  0x2a   :  { %1412 = vmatprep.subr.bf16.mxu1 %v1411_v9  ;;  %1408 = vmatprep.subr.bf16.mxu0 %v1600_v0  ;;  %v54_v17 = vld [vmem:[#allocation3] sm:$0xff]  ;;  %v1716_v18 = vpack.c.bf16 %v298_v16, %v297_v15  ;;  %v141_v21 = vld [vmem:[%s1920_s0 + $0x8] sm:$0xff]  ;;  %v142_v22 = vld [vmem:[%s1920_s0 + $0x10] sm:$0xff]  ;;  %v1734_v23 = vpack.c.bf16 %v300_v20, %v299_v19 }
  0x2b   :  { %1414 = vmatpush3.bf16.msra.mxu1 %v1411_v9  ;;  %v143_v24 = vld [vmem:[%s1920_s0 + $0x18] sm:$0xff]  ;;  %v144_v25 = vld [vmem:[%s1920_s0 + $0x20] sm:$0xff]  ;;  %v1750_v26 = vld [vmem:[#allocation6] sm:$0xff]  ;;  %p1577_p5 = por %p1576_p4, %p1575_p3 }
  0x2c   :  { %1416 = vmatprep.subr.bf16.mxu1 %v1415_v13  ;;  %v145_v27 = vld [vmem:[%s1920_s0 + $0x28] sm:$0xff]  ;;  %v146_v28 = vld [vmem:[%s1920_s0 + $0x30] sm:$0xff]  ;;  %v147_v29 = vld [vmem:[%s1920_s0 + $0x38] sm:$0xff] }
  0x2d   :  { %1410 = vmatpush3.bf16.msra.mxu0 %v1409_v12  ;;  %v1202_v30 = vld [vmem:[%s1926_s6] ss:$0 sm:$0xff]  ;;  %s1603_s6 = smov 64   ;;  %p1578_p6 = pnand %p1577_p5, %p1571_p2 }
  0x2e   :  { %1419 = vmatprep.subr.bf16.mxu0 %v1600_v0  ;;  %v1787_v39 = vld [vmem:[%s1927_s7] ss:$0 sm:$0xff]  ;;  %s1604_s7 = smov 32  }
  0x2f   :  { %1418 = vmatpush3.bf16.msra.mxu1 %v1415_v13 }
  0x30   :  { %1295 = vmatmul.mubr.msk.f32.vlgmr.msra.gmra.mrb[0].mxu0 %vm66_vm1, %v54_v17  ;;  %1431 = vmatprep.subr.bf16.mxu1 %v1600_v0 }
  0x31   :  { %1421 = vmatpush3.bf16.msra.mxu0 %v1716_v18  ;;  %1325 = vmatprep.mubr.msk.f32.mxu0 %vm1601_vm0, %v1602_v1 }
  0x32   :  { %1306 = vmatmul.mubr.msk.f32.vlgmr.msra.gmra.mrb[0].mxu1 %vm66_vm1, %v141_v21  ;;  %1422 = vmatprep.subr.bf16.mxu0 %v1600_v0 }
  0x33   :  { %1308 = vmatprep.mubr.msk.f32.mxu1 %vm66_vm1, %v142_v22  ;;  %1433 = vmatpush3.bf16.msra.mxu1 %v1716_v18 }
  0x34   :  { %1434 = vmatprep.subr.bf16.mxu1 %v1600_v0 }
  0x35   :  { %1424 = vmatpush3.bf16.msra.mxu0 %v1734_v23 }
  0x36   :  { %1309 = vmatmul.mubr.msk.f32.gmra.mrb[2].mxu1 %vm66_vm1, %v143_v24  ;;  %1425 = vmatprep.subr.bf16.mxu0 %v1600_v0 }
  0x37   :  { %1311 = vmatprep.mubr.msk.f32.mxu1 %vm66_vm1, %v144_v25  ;;  %1436 = vmatpush3.bf16.msra.mxu1 %v1734_v23 }
  0x38   :  { %1326 = vmatmul.mubr.msk.f32.vlgmr.msra.gmra.mrb[2].mxu0 %vm66_vm1, %v1750_v26  ;;  %1443 = vmatprep.subr.bf16.mxu1 %v1600_v0 }
  0x39   :  { %1427 = vmatpush3.bf16.msra.mxu0 %v1716_v18  ;;  %1336 = vmatprep.mubr.msk.f32.mxu0 %vm1601_vm0, %v1602_v1 }
  0x3a   :  { %1312 = vmatmul.mubr.msk.f32.gmra.mrb[4].mxu1 %vm66_vm1, %v145_v27  ;;  %1428 = vmatprep.subr.bf16.mxu0 %v1600_v0 }
  0x3b   :  { %1314 = vmatprep.mubr.msk.f32.mxu1 %vm66_vm1, %v146_v28 }
  0x3d   :  { %1430 = vmatpush3.bf16.msra.mxu0 %v1734_v23 }
  0x3e   :  { %1315 = vmatmul.mubr.msk.f32.gmra.mrb[6].mxu1 %vm66_vm1, %v147_v29  ;;  %1437 = vmatprep.subr.bf16.mxu0 %v1600_v0 }
  0x3f   :  { %1347 = vmatprep.mubr.msk.f32.mxu1 %vm1601_vm0, %v1602_v1 }
 0x103   :  { %v136_v31 = vpop.f32.mrb[0].mxu0 }
 0x104   :  { %v137_v32 = vadd.f32 %v1202_v30, %v136_v31  ;;  %v1296_v33 = vpop.f32.mrb[1].mxu0 }
 0x105   :  { %v1307_v34 = vpop.f32.mrb[0].mxu1 }
 0x106   :  { %v1782_v35 = vadd.f32 %v1307_v34, %v137_v32  ;;  %v242_v36 = vpop.f32.mrb[1].mxu1 }
 0x107   :  { %v281_v37 = vadd.f32 %v242_v36, %v137_v32 }
 0x109   :  { %v1310_v38 = vpop.f32.mrb[2].mxu1 }
 0x10a   :  { %v1789_v40 = vadd.f32 %v1310_v38, %v137_v32  ;;  %v252_v41 = vpop.f32.mrb[3].mxu1 }
 0x10b   :  { %v1791_v42 = vadd.f32 %v252_v41, %v137_v32  ;;  %v378_v43 = vpop.f32.mrb[2].mxu0 }
 0x10c   :  { %v379_v44 = vadd.f32 %v1787_v39, %v378_v43  ;;  %v1327_v45 = vpop.f32.mrb[3].mxu0 }
 0x10d   :  { %v1313_v46 = vpop.f32.mrb[4].mxu1 }
 0x10e   :  { %v1794_v47 = vadd.f32 %v1313_v46, %v137_v32  ;;  %v262_v48 = vpop.f32.mrb[5].mxu1  ;;  %391 = vrot.lane.b32.xlu0 %v379_v44, %s1603_s6  ;;  %v383_v54 = vadd.f32 %v379_v44, %v281_v37 }
 0x10f   :  { %v1797_v49 = vadd.f32 %v262_v48, %v137_v32 }
 0x110   :  { %v1214_v55 = vmul.f32 -1.442695, %v383_v54 }
 0x111   :  { %v1316_v50 = vpop.f32.mrb[6].mxu1 }
 0x112   :  { %v1799_v51 = vadd.f32 %v1316_v50, %v137_v32  ;;  %v272_v52 = vpop.f32.mrb[7].mxu1  ;;  %1478 = vpow2.f32 %v1214_v55 }
 0x113   :  { %v1801_v53 = vadd.f32 %v272_v52, %v137_v32 }
 0x11c   :  { %v1479_v56 = vpop.eup %1478 }
 0x11d   :  { %v387_v57 = vadd.f32 1.0, %v1479_v56 }
 0x11f   :  { %1480 = vrcp.f32 %v387_v57 }
 0x129   :  { %v1481_v58 = vpop.eup %1480 }
 0x180   :  { %v392_v59 = vpop.permute.xlu0 %391 }
 0x181   :  { %v394_v60 = vmul.f32 %v1481_v58, %v392_v59 }
 0x183   :  { %396 = vrot.lane.b32.xlu0 %v394_v60, %s1603_s6 }
 0x1f5   :  { %v397_v61 = vpop.permute.xlu0 %396 }
 0x1f6   :  { %v399_v62 = vadd.f32 %v397_v61, %v281_v37 }
 0x1f8   :  { %1482 = vtanh.f32 %v399_v62 }
 0x202   :  { %v1483_v63 = vpop.eup %1482 }
 0x203   :  { %402 = vrot.lane.b32.xlu1 %v1483_v63, %s1603_s6 }
 0x275   :  { %v403_v2 = vpop.permute.xlu1 %402 }
 0x276   :  { %v405_v3 = vsub.f32 %v1750_v26, %v403_v2 }
 0x278   :  { %407 = vrot.lane.b32.xlu1 %v405_v3, %s1604_s7 }
 0x2ea   :  { %v408_v4 = vpop.permute.xlu1 %407 }
 0x2eb   :  { %v410_v5 = vmul.f32 %v1481_v58, %v408_v4 }
 0x2ed   :  { %412 = vrot.lane.b32.xlu0 %v410_v5, %s1604_s7 }
 0x35f   :  { %v413_v6 = vpop.permute.xlu0 %412 }
 0x360   :  { %v415_v7 = vadd.f32 %v1483_v63, %v413_v6 }
 0x362   :  { %417 = vrot.lane.b32.xlu1 %v415_v7, %s1603_s6 }
 0x3d4   :  { %v418_v8 = vpop.permute.xlu1 %417 }
 0x3d5   :  { %420 = vst.msk [vmem:[#allocation8] sm:$0xff] %vm66_vm1, %v418_v8  ;;  %1337 = vmatmul.mubr.msk.f32.vlgmr.msra.gmra.mrb[4].mxu0 %vm66_vm1, %v418_v8 }
 0x3d6   :  { %1439 = vmatpush3.bf16.msra.mxu0 %v1716_v18  ;;  %1358 = vmatprep.mubr.msk.f32.mxu0 %vm1601_vm0, %v1602_v1 }
 0x3d7   :  { %1440 = vmatprep.subr.bf16.mxu0 %v1600_v0 }
 0x3da   :  { %1442 = vmatpush3.bf16.msra.mxu0 %v1734_v23 }
 0x3db   :  { %1449 = vmatprep.subr.bf16.mxu0 %v1600_v0 }
 0x4a8   :  { %v489_v9 = vpop.f32.mrb[4].mxu0 }
 0x4a9   :  { %v490_v10 = vadd.f32 %v1787_v39, %v489_v9  ;;  %v1338_v11 = vpop.f32.mrb[5].mxu0 }
 0x4ab   :  { %503 = vrot.lane.b32.xlu0 %v490_v10, %s1603_s6  ;;  %v495_v12 = vadd.f32 %v490_v10, %v1782_v35 }
 0x4ad   :  { %v1216_v13 = vmul.f32 -1.442695, %v495_v12 }
 0x4af   :  { %1484 = vpow2.f32 %v1216_v13 }
 0x4b9   :  { %v1485_v14 = vpop.eup %1484 }
 0x4ba   :  { %v499_v15 = vadd.f32 1.0, %v1485_v14 }
 0x4bc   :  { %1486 = vrcp.f32 %v499_v15 }
 0x4c6   :  { %v1487_v16 = vpop.eup %1486 }
 0x51d   :  { %v504_v17 = vpop.permute.xlu0 %503 }
 0x51e   :  { %v506_v19 = vmul.f32 %v1487_v16, %v504_v17 }
 0x520   :  { %508 = vrot.lane.b32.xlu1 %v506_v19, %s1603_s6 }
 0x592   :  { %v509_v20 = vpop.permute.xlu1 %508 }
 0x593   :  { %v511_v21 = vadd.f32 %v509_v20, %v1782_v35 }
 0x595   :  { %1488 = vtanh.f32 %v511_v21 }
 0x59f   :  { %v1489_v22 = vpop.eup %1488 }
 0x5a0   :  { %v513_v24 = vsub.f32 %v415_v7, %v1489_v22 }
 0x5a2   :  { %515 = vrot.lane.b32.xlu0 %v513_v24, %s1605_s21 }
 0x614   :  { %v516_v25 = vpop.permute.xlu0 %515 }
 0x615   :  { %v518_v26 = vmul.f32 %v1487_v16, %v516_v25 }
 0x617   :  { %520 = vrot.lane.b32.xlu1 %v518_v26, %s1604_s7 }
 0x689   :  { %v521_v27 = vpop.permute.xlu1 %520 }
 0x68a   :  { %v523_v28 = vadd.f32 %v1489_v22, %v521_v27 }
 0x68c   :  { %525 = vrot.lane.b32.xlu0 %v523_v28, %s1603_s6 }
 0x6fe   :  { %v526_v29 = vpop.permute.xlu0 %525 }
 0x6ff   :  { %529 = vst.msk [vmem:[#allocation8 + $0x8] sm:$0xff] %vm66_vm1, %v526_v29  ;;  %1348 = vmatmul.mubr.msk.f32.vlgmr.msra.gmra.mrb[8].mxu1 %vm66_vm1, %v526_v29 }
 0x700   :  { %1445 = vmatpush3.bf16.msra.mxu1 %v1716_v18  ;;  %1369 = vmatprep.mubr.msk.f32.mxu1 %vm1601_vm0, %v1602_v1 }
 0x701   :  { %1446 = vmatprep.subr.bf16.mxu1 %v1600_v0 }
 0x704   :  { %1448 = vmatpush3.bf16.msra.mxu1 %v1734_v23 }
 0x705   :  { %1455 = vmatprep.subr.bf16.mxu1 %v1600_v0 }
 0x7d2   :  { %v598_v30 = vpop.f32.mrb[8].mxu1 }
 0x7d3   :  { %v599_v31 = vadd.f32 %v1787_v39, %v598_v30  ;;  %v1349_v32 = vpop.f32.mrb[9].mxu1 }
 0x7d5   :  { %612 = vrot.lane.b32.xlu1 %v599_v31, %s1603_s6  ;;  %v604_v33 = vadd.f32 %v599_v31, %v1791_v42 }
 0x7d7   :  { %v1218_v34 = vmul.f32 -1.442695, %v604_v33 }
 0x7d9   :  { %1490 = vpow2.f32 %v1218_v34 }
 0x7e3   :  { %v1491_v35 = vpop.eup %1490 }
 0x7e4   :  { %v608_v36 = vadd.f32 1.0, %v1491_v35 }
 0x7e6   :  { %1492 = vrcp.f32 %v608_v36 }
 0x7f0   :  { %v1493_v37 = vpop.eup %1492 }
 0x847   :  { %v613_v38 = vpop.permute.xlu1 %612 }
 0x848   :  { %v615_v41 = vmul.f32 %v1493_v37, %v613_v38 }
 0x84a   :  { %617 = vrot.lane.b32.xlu0 %v615_v41, %s1603_s6 }
 0x8bc   :  { %v618_v43 = vpop.permute.xlu0 %617 }
 0x8bd   :  { %v620_v44 = vadd.f32 %v618_v43, %v1791_v42 }
 0x8bf   :  { %1494 = vtanh.f32 %v620_v44 }
 0x8c9   :  { %v1495_v45 = vpop.eup %1494 }
 0x8ca   :  { %v622_v46 = vsub.f32 %v523_v28, %v1495_v45 }
 0x8cc   :  { %624 = vrot.lane.b32.xlu1 %v622_v46, %s1605_s21 }
 0x93e   :  { %v625_v48 = vpop.permute.xlu1 %624 }
 0x93f   :  { %v627_v50 = vmul.f32 %v1493_v37, %v625_v48 }
 0x941   :  { %629 = vrot.lane.b32.xlu0 %v627_v50, %s1604_s7 }
 0x9b3   :  { %v630_v52 = vpop.permute.xlu0 %629 }
 0x9b4   :  { %v632_v54 = vadd.f32 %v1495_v45, %v630_v52 }
 0x9b6   :  { %634 = vrot.lane.b32.xlu1 %v632_v54, %s1603_s6 }
 0xa28   :  { %v635_v55 = vpop.permute.xlu1 %634 }
 0xa29   :  { %638 = vst.msk [vmem:[#allocation8 + $0x10] sm:$0xff] %vm66_vm1, %v635_v55  ;;  %1359 = vmatmul.mubr.msk.f32.vlgmr.msra.gmra.mrb[6].mxu0 %vm66_vm1, %v635_v55 }
 0xa2a   :  { %1451 = vmatpush3.bf16.msra.mxu0 %v1716_v18  ;;  %1380 = vmatprep.mubr.msk.f32.mxu0 %vm1601_vm0, %v1602_v1 }
 0xa2b   :  { %1452 = vmatprep.subr.bf16.mxu0 %v1600_v0 }
 0xa2e   :  { %1454 = vmatpush3.bf16.msra.mxu0 %v1734_v23 }
 0xa2f   :  { %1461 = vmatprep.subr.bf16.mxu0 %v1600_v0 }
 0xafc   :  { %v707_v42 = vpop.f32.mrb[6].mxu0 }
 0xafd   :  { %v708_v56 = vadd.f32 %v1787_v39, %v707_v42  ;;  %v1360_v57 = vpop.f32.mrb[7].mxu0 }
 0xaff   :  { %721 = vrot.lane.b32.xlu0 %v708_v56, %s1603_s6  ;;  %v713_v58 = vadd.f32 %v708_v56, %v1789_v40 }
 0xb01   :  { %v1220_v59 = vmul.f32 -1.442695, %v713_v58 }
 0xb03   :  { %1496 = vpow2.f32 %v1220_v59 }
 0xb0d   :  { %v1497_v60 = vpop.eup %1496 }
 0xb0e   :  { %v717_v61 = vadd.f32 1.0, %v1497_v60 }
 0xb10   :  { %1498 = vrcp.f32 %v717_v61 }
 0xb1a   :  { %v1499_v62 = vpop.eup %1498 }
 0xb71   :  { %v722_v63 = vpop.permute.xlu0 %721 }
 0xb72   :  { %v724_v2 = vmul.f32 %v1499_v62, %v722_v63 }
 0xb74   :  { %726 = vrot.lane.b32.xlu1 %v724_v2, %s1603_s6 }
 0xbe6   :  { %v727_v3 = vpop.permute.xlu1 %726 }
 0xbe7   :  { %v729_v4 = vadd.f32 %v727_v3, %v1789_v40 }
 0xbe9   :  { %1500 = vtanh.f32 %v729_v4 }
 0xbf3   :  { %v1501_v5 = vpop.eup %1500 }
 0xbf4   :  { %v731_v6 = vsub.f32 %v632_v54, %v1501_v5 }
 0xbf6   :  { %733 = vrot.lane.b32.xlu0 %v731_v6, %s1605_s21 }
 0xc68   :  { %v734_v7 = vpop.permute.xlu0 %733 }
 0xc69   :  { %v736_v8 = vmul.f32 %v1499_v62, %v734_v7 }
 0xc6b   :  { %738 = vrot.lane.b32.xlu1 %v736_v8, %s1604_s7 }
 0xcdd   :  { %v739_v9 = vpop.permute.xlu1 %738 }
 0xcde   :  { %v741_v10 = vadd.f32 %v1501_v5, %v739_v9 }
 0xce0   :  { %743 = vrot.lane.b32.xlu0 %v741_v10, %s1603_s6 }
 0xd52   :  { %v744_v11 = vpop.permute.xlu0 %743 }
 0xd53   :  { %747 = vst.msk [vmem:[#allocation8 + $0x18] sm:$0xff] %vm66_vm1, %v744_v11  ;;  %1370 = vmatmul.mubr.msk.f32.vlgmr.msra.gmra.mrb[10].mxu1 %vm66_vm1, %v744_v11 }
 0xd54   :  { %1457 = vmatpush3.bf16.msra.mxu1 %v1716_v18  ;;  %1391 = vmatprep.mubr.msk.f32.mxu1 %vm1601_vm0, %v1602_v1 }
 0xd55   :  { %1458 = vmatprep.subr.bf16.mxu1 %v1600_v0 }
 0xd58   :  { %1460 = vmatpush3.bf16.msra.mxu1 %v1734_v23 }
 0xe26   :  { %v816_v40 = vpop.f32.mrb[10].mxu1 }
 0xe27   :  { %v817_v12 = vadd.f32 %v1787_v39, %v816_v40  ;;  %v1371_v13 = vpop.f32.mrb[11].mxu1 }
 0xe29   :  { %830 = vrot.lane.b32.xlu1 %v817_v12, %s1603_s6  ;;  %v822_v14 = vadd.f32 %v817_v12, %v1797_v49 }
 0xe2b   :  { %v1222_v15 = vmul.f32 -1.442695, %v822_v14 }
 0xe2d   :  { %1502 = vpow2.f32 %v1222_v15 }
 0xe37   :  { %v1503_v16 = vpop.eup %1502 }
 0xe38   :  { %v826_v17 = vadd.f32 1.0, %v1503_v16 }
 0xe3a   :  { %1504 = vrcp.f32 %v826_v17 }
 0xe44   :  { %v1505_v19 = vpop.eup %1504 }
 0xe9b   :  { %v831_v20 = vpop.permute.xlu1 %830 }
 0xe9c   :  { %v833_v21 = vmul.f32 %v1505_v19, %v831_v20 }
 0xe9e   :  { %835 = vrot.lane.b32.xlu0 %v833_v21, %s1603_s6 }
 0xf10   :  { %v836_v22 = vpop.permute.xlu0 %835 }
 0xf11   :  { %v838_v24 = vadd.f32 %v836_v22, %v1797_v49 }
 0xf13   :  { %1506 = vtanh.f32 %v838_v24 }
 0xf1d   :  { %v1507_v25 = vpop.eup %1506 }
 0xf1e   :  { %v840_v26 = vsub.f32 %v741_v10, %v1507_v25 }
 0xf20   :  { %842 = vrot.lane.b32.xlu1 %v840_v26, %s1605_s21 }
 0xf92   :  { %v843_v27 = vpop.permute.xlu1 %842 }
 0xf93   :  { %v845_v28 = vmul.f32 %v1505_v19, %v843_v27 }
 0xf95   :  { %847 = vrot.lane.b32.xlu0 %v845_v28, %s1604_s7 }
0x1007   :  { %v848_v29 = vpop.permute.xlu0 %847 }
0x1008   :  { %v850_v30 = vadd.f32 %v1507_v25, %v848_v29 }
0x100a   :  { %852 = vrot.lane.b32.xlu1 %v850_v30, %s1603_s6 }
0x107c   :  { %v853_v31 = vpop.permute.xlu1 %852 }
0x107d   :  { %856 = vst.msk [vmem:[#allocation8 + $0x20] sm:$0xff] %vm66_vm1, %v853_v31  ;;  %1381 = vmatmul.mubr.msk.f32.vlgmr.msra.gmra.mrb[8].mxu0 %vm66_vm1, %v853_v31 }
0x107e   :  { %1463 = vmatpush3.bf16.msra.mxu0 %v1716_v18  ;;  %1402 = vmatprep.mubr.msk.f32.mxu0 %vm1601_vm0, %v1602_v1 }
0x107f   :  { %1464 = vmatprep.subr.bf16.mxu0 %v1600_v0 }
0x1082   :  { %1466 = vmatpush3.bf16.msra.mxu0 %v1734_v23 }
0x1150   :  { %v925_v49 = vpop.f32.mrb[8].mxu0 }
0x1151   :  { %v926_v32 = vadd.f32 %v1787_v39, %v925_v49  ;;  %v1382_v33 = vpop.f32.mrb[9].mxu0 }
0x1153   :  { %939 = vrot.lane.b32.xlu0 %v926_v32, %s1603_s6  ;;  %v931_v34 = vadd.f32 %v926_v32, %v1794_v47 }
0x1155   :  { %v1224_v35 = vmul.f32 -1.442695, %v931_v34 }
0x1157   :  { %1508 = vpow2.f32 %v1224_v35 }
0x1161   :  { %v1509_v36 = vpop.eup %1508 }
0x1162   :  { %v935_v37 = vadd.f32 1.0, %v1509_v36 }
0x1164   :  { %1510 = vrcp.f32 %v935_v37 }
0x116e   :  { %v1511_v18 = vpop.eup %1510 }
0x11c5   :  { %v940_v38 = vpop.permute.xlu0 %939 }
0x11c6   :  { %v942_v1 = vmul.f32 %v1511_v18, %v940_v38 }
0x11c8   :  { %944 = vrot.lane.b32.xlu1 %v942_v1, %s1603_s6 }
0x123a   :  { %v945_v0 = vpop.permute.xlu1 %944 }
0x123b   :  { %v947_v23 = vadd.f32 %v945_v0, %v1794_v47 }
0x123d   :  { %1512 = vtanh.f32 %v947_v23 }
0x1247   :  { %v1513_v41 = vpop.eup %1512 }
0x1248   :  { %v949_v43 = vsub.f32 %v850_v30, %v1513_v41 }
0x124a   :  { %951 = vrot.lane.b32.xlu0 %v949_v43, %s1605_s21 }
0x12bc   :  { %v952_v44 = vpop.permute.xlu0 %951 }
0x12bd   :  { %v954_v45 = vmul.f32 %v1511_v18, %v952_v44 }
0x12bf   :  { %956 = vrot.lane.b32.xlu1 %v954_v45, %s1604_s7 }
0x1331   :  { %v957_v46 = vpop.permute.xlu1 %956 }
0x1332   :  { %v959_v48 = vadd.f32 %v1513_v41, %v957_v46 }
0x1334   :  { %961 = vrot.lane.b32.xlu0 %v959_v48, %s1603_s6 }
0x13a6   :  { %v962_v50 = vpop.permute.xlu0 %961 }
0x13a7   :  { %965 = vst.msk [vmem:[#allocation8 + $0x28] sm:$0xff] %vm66_vm1, %v962_v50  ;;  %1392 = vmatmul.mubr.msk.f32.vlgmr.msra.gmra.mrb[12].mxu1 %vm66_vm1, %v962_v50 }
0x147a   :  { %v1034_v52 = vpop.f32.mrb[12].mxu1 }
0x147b   :  { %v1035_v47 = vadd.f32 %v1787_v39, %v1034_v52  ;;  %v1393_v54 = vpop.f32.mrb[13].mxu1 }
0x147d   :  { %1048 = vrot.lane.b32.xlu1 %v1035_v47, %s1603_s6  ;;  %v1040_v55 = vadd.f32 %v1035_v47, %v1801_v53 }
0x147f   :  { %v1226_v42 = vmul.f32 -1.442695, %v1040_v55 }
0x1481   :  { %1514 = vpow2.f32 %v1226_v42 }
0x148b   :  { %v1515_v56 = vpop.eup %1514 }
0x148c   :  { %v1044_v57 = vadd.f32 1.0, %v1515_v56 }
0x148e   :  { %1516 = vrcp.f32 %v1044_v57 }
0x1498   :  { %v1517_v58 = vpop.eup %1516 }
0x14ef   :  { %v1049_v59 = vpop.permute.xlu1 %1048 }
0x14f0   :  { %v1051_v60 = vmul.f32 %v1517_v58, %v1049_v59 }
0x14f2   :  { %1053 = vrot.lane.b32.xlu0 %v1051_v60, %s1603_s6 }
0x1564   :  { %v1054_v61 = vpop.permute.xlu0 %1053 }
0x1565   :  { %v1056_v62 = vadd.f32 %v1054_v61, %v1801_v53 }
0x1567   :  { %1518 = vtanh.f32 %v1056_v62 }
0x1571   :  { %v1519_v63 = vpop.eup %1518 }
0x1572   :  { %v1058_v2 = vsub.f32 %v959_v48, %v1519_v63 }
0x1574   :  { %1060 = vrot.lane.b32.xlu1 %v1058_v2, %s1605_s21 }
0x15e6   :  { %v1061_v3 = vpop.permute.xlu1 %1060 }
0x15e7   :  { %v1063_v4 = vmul.f32 %v1517_v58, %v1061_v3 }
0x15e9   :  { %1065 = vrot.lane.b32.xlu0 %v1063_v4, %s1604_s7 }
0x165b   :  { %v1066_v5 = vpop.permute.xlu0 %1065 }
0x165c   :  { %v1068_v6 = vadd.f32 %v1519_v63, %v1066_v5 }
0x165e   :  { %1070 = vrot.lane.b32.xlu1 %v1068_v6, %s1603_s6 }
0x16d0   :  { %v1071_v7 = vpop.permute.xlu1 %1070 }
0x16d1   :  { %1074 = vst.msk [vmem:[#allocation8 + $0x30] sm:$0xff] %vm66_vm1, %v1071_v7  ;;  %1403 = vmatmul.mubr.msk.f32.vlgmr.msra.gmra.mrb[10].mxu0 %vm66_vm1, %v1071_v7 }
0x17a4   :  { %v1143_v8 = vpop.f32.mrb[10].mxu0 }
0x17a5   :  { %v1144_v53 = vadd.f32 %v1787_v39, %v1143_v8  ;;  %v1404_v9 = vpop.f32.mrb[11].mxu0 }
0x17a7   :  { %1157 = vrot.lane.b32.xlu0 %v1144_v53, %s1603_s6  ;;  %v1149_v10 = vadd.f32 %v1144_v53, %v1799_v51 }
0x17a9   :  { %v1228_v11 = vmul.f32 -1.442695, %v1149_v10 }
0x17ab   :  { %1520 = vpow2.f32 %v1228_v11 }
0x17b5   :  { %v1521_v40 = vpop.eup %1520 }
0x17b6   :  { %v1153_v12 = vadd.f32 1.0, %v1521_v40 }
0x17b8   :  { %1522 = vrcp.f32 %v1153_v12 }
0x17c2   :  { %v1523_v13 = vpop.eup %1522 }
0x1819   :  { %v1158_v14 = vpop.permute.xlu0 %1157 }
0x181a   :  { %v1160_v15 = vmul.f32 %v1523_v13, %v1158_v14 }
0x181c   :  { %1162 = vrot.lane.b32.xlu1 %v1160_v15, %s1603_s6 }
0x188e   :  { %v1163_v16 = vpop.permute.xlu1 %1162 }
0x188f   :  { %v1165_v17 = vadd.f32 %v1163_v16, %v1799_v51 }
0x1891   :  { %1524 = vtanh.f32 %v1165_v17 }
0x189b   :  { %v1525_v39 = vpop.eup %1524 }
0x189c   :  { %v1167_v19 = vsub.f32 %v1068_v6, %v1525_v39 }
0x189e   :  { %1169 = vrot.lane.b32.xlu0 %v1167_v19, %s1605_s21 }
0x1910   :  { %v1170_v20 = vpop.permute.xlu0 %1169 }
0x1911   :  { %v1172_v21 = vmul.f32 %v1523_v13, %v1170_v20 }
0x1913   :  { %1174 = vrot.lane.b32.xlu1 %v1172_v21, %s1604_s7 }
0x1985   :  { %v1175_v22 = vpop.permute.xlu1 %1174 }
0x1986   :  { %v1177_v24 = vadd.f32 %v1525_v39, %v1175_v22 }
0x1988   :  { %1179 = vrot.lane.b32.xlu0 %v1177_v24, %s1603_s6 }
0x19fa   :  { %v1180_v25 = vpop.permute.xlu0 %1179 }
0x19fb   :  { %1183 = vst.msk [vmem:[#allocation8 + $0x38] sm:$0xff] %vm66_vm1, %v1180_v25 }
0x19fc   :  { %1581 = shalt.err (!%p1578_p6)
}
0x19fd   :  { %s1582_s3 = scalar_lea.hbm %s1928_s8, 1024 }
0x19fe   :  { %p1583_p7 = scmp.ne.s32.totalorder %s1928_s8, %s1582_s3  ;;  %p1586_p8 = scmp.lt.u32.totalorder %s1582_s3, %s1928_s8 }
0x1a00   :  { %p1588_p9 = pnand %p1586_p8, %p1583_p7 }
0x1a02   :  { %1591 = shalt.err (!%p1588_p9)
}
0x1a03   :  { %s1607_s29 = smov 128   ;;  %s1608_s9 = smov 8  }
0x1a04   :  { %1195 = dma.vmem_to_hbm [thread:$0]  %s1190_s4, 1024, %s1928_s8, [#allocation5], %s1607_s29, %s1607_s29, %s1608_s9  }
0x1a05   :  { %1596 = dma.done.wait [#allocation5], 1024  }
0x1a06   :  { %1597 = vsyncadd [#allocation5], 4294966272 }
0x1a07   :  { %1199 = vsyncpa [#allocation4], 1 }
0x1a08   :  { %1200 = vsyncpa [#allocation7], 1 }
0x1a09   :  { %1201 = vsyncpa [#allocation5], 1 }

</bundles_post_ra>
